<compile_context>
chip_gen: v7x
topology: tpu7x:2x2x1
jax: 0.10.0
libtpu: 0.0.40
codegen_flags: <defaults>
</compile_context>

<pallas_src>
import jax
import jax.numpy as jnp
from jax.experimental import pallas as pl
from jax.experimental.pallas import tpu as pltpu


def _round_up(x, m):
    return (x + m - 1) // m * m


def fastrcnn_head_kernel(x_ref, w_ref, b_ref, out_ref):
    # One fused matmul (cls + box heads) on the MXU, single f32 bias-add
    # epilogue, lane-dense (multiple-of-128) unmasked store.
    acc = jnp.dot(x_ref[...], w_ref[...], preferred_element_type=jnp.float32)
    out_ref[...] = (acc + b_ref[...]).astype(out_ref.dtype)


def fastrcnn_predictor(x_nchw, w_cls, b_cls, w_box, b_box,
                       *, tile_n=256, compute_dtype=None):
    """FastRCNNPredictor head: (N, C, 1, 1) pooled features -> (scores, deltas)."""
    n, c = x_nchw.shape[0], x_nchw.shape[1]
    x = x_nchw.reshape(n, c)                      # flatten(start_dim=1)
    n_cls = w_cls.shape[1]
    n_box = w_box.shape[1]
    out_dim = n_cls + n_box

    # --- Fuse the two linears; pad output lanes to a multiple of 128. -------
    out_pad = _round_up(out_dim, 128)
    w = jnp.concatenate([w_cls, w_box], axis=1)               # (C, out_dim)
    b = jnp.concatenate([b_cls, b_box], axis=1)               # (1, out_dim)
    if out_pad != out_dim:
        w = jnp.pad(w, ((0, 0), (0, out_pad - out_dim)))
        b = jnp.pad(b, ((0, 0), (0, out_pad - out_dim)))

    # Optional bf16 inputs for v6e/v7x (halves HBM traffic; f32 accumulate).
    if compute_dtype is not None:
        x = x.astype(compute_dtype)
        w = w.astype(compute_dtype)

    # --- Row tiling over RoIs (parallel grid -> DMA overlap / dual-TC). -----
    tile = min(tile_n, _round_up(n, 8))
    n_pad = _round_up(n, tile)
    if n_pad != n:
        x = jnp.pad(x, ((0, n_pad - n), (0, 0)))
    grid = (n_pad // tile,)

    itemsize = jnp.dtype(x.dtype).itemsize
    cost = pl.CostEstimate(
        flops=2 * n_pad * c * out_pad,
        transcendentals=0,
        bytes_accessed=(itemsize * (n_pad * c + c * out_pad)
                        + 4 * (out_pad + n_pad * out_pad)),
    )

    fused = pl.pallas_call(
        fastrcnn_head_kernel,
        out_shape=jax.ShapeDtypeStruct((n_pad, out_pad), jnp.float32),
        grid=grid,
        in_specs=[
            pl.BlockSpec((tile, c), lambda i: (i, 0)),        # x: row-tiled
            pl.BlockSpec((c, out_pad), lambda i: (0, 0)),     # fused W: resident
            pl.BlockSpec((1, out_pad), lambda i: (0, 0)),     # fused bias
        ],
        out_specs=pl.BlockSpec((tile, out_pad), lambda i: (i, 0)),
        compiler_params=pltpu.CompilerParams(
            dimension_semantics=("parallel",)),
        cost_estimate=cost,
    )(x, w, b)

    scores = fused[:n, :n_cls]
    deltas = fused[:n, n_cls:out_dim]
    return scores, deltas


if __name__ == "__main__":
    # Small, detector-consistent shapes:
    #   N_ROIS pooled RoIs, IN_FEATURES box-head features, N_CLS classes.
    N_ROIS, IN_FEATURES, N_CLS = 16, 256, 8

    key = jax.random.PRNGKey(0)
    kx, kwc, kbc, kwb, kbb = jax.random.split(key, 5)

    # Pooled RoI features as the PyTorch head sees them: (N, C, 1, 1) NCHW.
    x = jax.random.normal(kx, (N_ROIS, IN_FEATURES, 1, 1), jnp.float32)

    # Synthetic FastRCNNPredictor parameters:
    #   cls_score: Linear(IN_FEATURES, N_CLS)
    #   bbox_pred: Linear(IN_FEATURES, 4 * N_CLS)
    w_cls = jax.random.normal(kwc, (IN_FEATURES, N_CLS), jnp.float32) * 0.02
    b_cls = jax.random.normal(kbc, (1, N_CLS), jnp.float32) * 0.02
    w_box = jax.random.normal(kwb, (IN_FEATURES, 4 * N_CLS), jnp.float32) * 0.02
    b_box = jax.random.normal(kbb, (1, 4 * N_CLS), jnp.float32) * 0.02

    scores, bbox_deltas = fastrcnn_predictor(x, w_cls, b_cls, w_box, b_box)
    jax.block_until_ready((scores, bbox_deltas))

    # Cross-check against plain-JAX reference of the head.
    x2d = x.reshape(N_ROIS, IN_FEATURES)
    ref_scores = x2d @ w_cls + b_cls
    ref_deltas = x2d @ w_box + b_box
    assert scores.shape == (N_ROIS, N_CLS)
    assert bbox_deltas.shape == (N_ROIS, 4 * N_CLS)
    assert jnp.allclose(scores, ref_scores, atol=1e-4, rtol=1e-4)
    assert jnp.allclose(bbox_deltas, ref_deltas, atol=1e-4, rtol=1e-4)

    print("KERNEL_OK")
</pallas_src>

<mosaic_0001>
module attributes {stable_mosaic.version = 11 : i64} {
  func.func @fastrcnn_head_kernel(%arg0: i32, %arg1: memref<16x256xf32, #tpu.memory_space<vmem>>, %arg2: memref<256x128xf32, #tpu.memory_space<vmem>>, %arg3: memref<1x128xf32, #tpu.memory_space<vmem>>, %arg4: memref<16x128xf32, #tpu.memory_space<vmem>>) attributes {dimension_semantics = [#tpu.dimension_semantics<parallel>], iteration_bounds = array<i64: 1>, scalar_prefetch = 0 : i64, scratch_operands = 0 : i64, tpu.core_type = #tpu.core_type<tc>, window_params = [{transform_indices = @transform_0, window_bounds = array<i64: 16, 256>}, {pipeline_mode = #tpu.pipeline_mode<synchronous>, transform_indices = @transform_1, window_bounds = array<i64: 256, 128>}, {pipeline_mode = #tpu.pipeline_mode<synchronous>, transform_indices = @transform_2, window_bounds = array<i64: 1, 128>}, {transform_indices = @transform_3, window_bounds = array<i64: 16, 128>}]} {
    %c0 = arith.constant 0 : index
    %c0_0 = arith.constant 0 : index
    %0 = vector.load %arg1[%c0, %c0_0] : memref<16x256xf32, #tpu.memory_space<vmem>>, vector<16x256xf32>
    %c0_1 = arith.constant 0 : index
    %c0_2 = arith.constant 0 : index
    %1 = vector.load %arg2[%c0_1, %c0_2] : memref<256x128xf32, #tpu.memory_space<vmem>>, vector<256x128xf32>
    %cst = arith.constant dense<0.000000e+00> : vector<16x128xf32>
    %2 = tpu.matmul %0, %1, %cst {dimension_numbers = #tpu.dot_dimension_numbers<[1], [0], [0], [1], [0, 0, 1, 1], [], []>} : vector<16x256xf32>, vector<256x128xf32>, vector<16x128xf32> -> vector<16x128xf32>
    %c0_3 = arith.constant 0 : index
    %c0_4 = arith.constant 0 : index
    %3 = vector.load %arg3[%c0_3, %c0_4] : memref<1x128xf32, #tpu.memory_space<vmem>>, vector<1x128xf32>
    %4 = vector.broadcast %3 : vector<1x128xf32> to vector<16x128xf32>
    %5 = arith.addf %2, %4 : vector<16x128xf32>
    %c0_5 = arith.constant 0 : index
    %c0_6 = arith.constant 0 : index
    %6 = vector.load %arg4[%c0_5, %c0_6] : memref<16x128xf32, #tpu.memory_space<vmem>>, vector<16x128xf32>
    tpu.vector_store %arg4[%c0_5, %c0_6], %5 {strides = array<i32>} : memref<16x128xf32, #tpu.memory_space<vmem>>, vector<16x128xf32>,
    return
  }
  func.func @transform_0(%arg0: i32) -> (i32, i32) {
    %c0_i32 = arith.constant 0 : i32
    %c0_i32_0 = arith.constant 0 : i32
    return %arg0, %c0_i32 : i32, i32
  }
  func.func @transform_1(%arg0: i32) -> (i32, i32) {
    %c0_i32 = arith.constant 0 : i32
    %c0_i32_0 = arith.constant 0 : i32
    %c0_i32_1 = arith.constant 0 : i32
    return %c0_i32, %c0_i32_0 : i32, i32
  }
  func.func @transform_2(%arg0: i32) -> (i32, i32) {
    %c0_i32 = arith.constant 0 : i32
    %c0_i32_0 = arith.constant 0 : i32
    %c0_i32_1 = arith.constant 0 : i32
    return %c0_i32, %c0_i32_0 : i32, i32
  }
  func.func @transform_3(%arg0: i32) -> (i32, i32) {
    %c0_i32 = arith.constant 0 : i32
    %c0_i32_0 = arith.constant 0 : i32
    return %arg0, %c0_i32 : i32, i32
  }
}

</mosaic_0001>

<bundles_post_ra>
// kernel: tpu_custom_call.1
= control target key start
LH: loop header
LB: loop body
LE: loop exit
PB: predicated region body
PF: predicated region fallthrough
CT: control target
= control target key end

     0   :  { %8 = vsyncpa [#allocation3], 0  ;;  %s419_s0 = inlined_call_operand.hbm [shape: f32[16,256], index: 0, kind: input, shape index: {}]   ;;  %s420_s1 = inlined_call_operand.hbm [shape: f32[256,128], index: 1, kind: input, shape index: {}]   ;;  %s421_s2 = inlined_call_operand.vmem [shape: f32[1,128], index: 2, kind: input, shape index: {}]   ;;  %s422_s3 = inlined_call_operand.hbm [shape: f32[16,128], index: 3, kind: output, shape index: {}]  }
   0x1   :  { %9 = vsyncpa [#allocation6], 0 }
   0x2   :  { %10 = vsyncpa [#allocation4], 0  ;;  %s347_s12 = smov [#allocation2]   ;;  %s275_s16 = scalar_lea.hbm %s419_s0, 512 }
   0x3   :  { %s16_s13 = sshll.u32 %s347_s12, 4  ;;  %p276_p0 = scmp.ne.s32.totalorder %s419_s0, %s275_s16  ;;  %s17_s13 = int_to_ptr.vmem [resolvable:$true] %s16_s13 }
   0x4   :  { %p279_p1 = scmp.lt.u32.totalorder %s275_s16, %s419_s0 }
   0x6   :  { %p281_p2 = pnand %p279_p1, %p276_p0 }
   0x8   :  { %284 = shalt.err (!%p281_p2)
}
   0x9   :  { %s285_s21 = scalar_lea.vmem %s17_s13, 512  ;;  %p290_p4 = scmp.lt.s32.totalorder %s17_s13, %s17_s13 }
   0xa   :  { %p286_p3 = scmp.ne.s32.totalorder %s17_s13, %s285_s21  ;;  %p291_p5 = scmp.lt.s32.totalorder %s285_s21, %s285_s21 }
   0xc   :  { %p292_p6 = por %p291_p5, %p290_p4 }
   0xe   :  { %p293_p7 = pnand %p292_p6, %p286_p3 }
  0x10   :  { %296 = shalt.err (!%p293_p7)
}
  0x11   :  { %s348_s22 = smov 256   ;;  %s349_s23 = smov 16  }
  0x12   :  { %22 = dma.hbm_to_vmem [thread:$0]  %s419_s0, 512, %s17_s13, [#allocation3], %s348_s22, %s348_s22, %s349_s23  }
  0x13   :  { %s350_s26 = smov [#allocation5]   ;;  %s297_s30 = scalar_lea.hbm %s420_s1, 4096 }
  0x14   :  { %s28_s27 = sshll.u32 %s350_s26, 4  ;;  %p298_p8 = scmp.ne.s32.totalorder %s420_s1, %s297_s30  ;;  %s29_s27 = int_to_ptr.vmem [resolvable:$true] %s28_s27 }
  0x15   :  { %p301_p9 = scmp.lt.u32.totalorder %s297_s30, %s420_s1 }
  0x17   :  { %p303_p10 = pnand %p301_p9, %p298_p8 }
  0x19   :  { %306 = shalt.err (!%p303_p10)
}
  0x1a   :  { %s307_s8 = scalar_lea.vmem %s29_s27, 4096  ;;  %p312_p12 = scmp.lt.s32.totalorder %s29_s27, %s29_s27 }
  0x1b   :  { %p308_p11 = scmp.ne.s32.totalorder %s29_s27, %s307_s8  ;;  %p313_p13 = scmp.lt.s32.totalorder %s307_s8, %s307_s8 }
  0x1d   :  { %p314_p0 = por %p313_p13, %p312_p12 }
  0x1f   :  { %p315_p1 = pnand %p314_p0, %p308_p11 }
  0x21   :  { %318 = shalt.err (!%p315_p1)
}
  0x22   :  { %s351_s0 = smov 128   ;;  %s352_s9 = smov 8  }
  0x23   :  { %34 = dma.hbm_to_vmem [thread:$0]  %s420_s1, 4096, %s29_s27, [#allocation6], %s351_s0, %s351_s0, %s352_s9  }
  0x24   :  { %341 = dma.done.wait [#allocation3], 512  }
  0x25   :  { %342 = vsyncadd [#allocation3], 4294966784 }
  0x26   :  { %343 = dma.done.wait [#allocation6], 4096  }
  0x27   :  { %344 = vsyncadd [#allocation6], 4294963200  ;;  %v63_v0 = vld [vmem:[#allocation5 + $0x80] sm:$0xff]  ;;  %v64_v1 = vld [vmem:[#allocation5 + $0x88] sm:$0xff]  ;;  %s353_s13 = smov [#allocation7]  }
  0x28   :  { %v47_v2 = vld [vmem:[#allocation5] sm:$0xff]  ;;  %v220_v3 = vpack.c.bf16 %v64_v1, %v63_v0  ;;  %v48_v4 = vld [vmem:[#allocation5 + $0x8] sm:$0xff]  ;;  %v65_v5 = vld [vmem:[#allocation5 + $0x90] sm:$0xff]  ;;  %s168_s14 = sshll.u32 %s353_s13, 4  ;;  %s169_s14 = int_to_ptr.vmem [resolvable:$true] %s168_s14 }
  0x29   :  { %v66_v6 = vld [vmem:[#allocation5 + $0x98] sm:$0xff]  ;;  %v222_v7 = vpack.c.bf16 %v48_v4, %v47_v2  ;;  %v49_v9 = vld [vmem:[#allocation5 + $0x10] sm:$0xff]  ;;  %v67_v11 = vld [vmem:[#allocation5 + $0xa0] sm:$0xff]  ;;  %s319_s15 = scalar_lea.vmem %s169_s14, 256  ;;  %p324_p3 = scmp.lt.s32.totalorder %s169_s14, %s169_s14 }
  0x2a   :  { %v224_v8 = vpack.c.bf16 %v66_v6, %v65_v5  ;;  %v50_v10 = vld [vmem:[#allocation5 + $0x18] sm:$0xff]  ;;  %221 = vmatprep.subr.bf16.mxu0 %v220_v3  ;;  %252 = vmatprep.subr.bf16.mxu1 %v220_v3  ;;  %v68_v12 = vld [vmem:[#allocation5 + $0xa8] sm:$0xff]  ;;  %v51_v15 = vld [vmem:[#allocation5 + $0x20] sm:$0xff]  ;;  %p320_p2 = scmp.ne.s32.totalorder %s169_s14, %s319_s15  ;;  %p325_p4 = scmp.lt.s32.totalorder %s319_s15, %s319_s15 }
  0x2b   :  { %223 = vmatpush3.bf16.msra.mxu0 %v222_v7  ;;  %260 = vmatpush3.bf16.msra.mxu1 %v222_v7  ;;  %v226_v13 = vpack.c.bf16 %v50_v10, %v49_v9  ;;  %v228_v14 = vpack.c.bf16 %v68_v12, %v67_v11  ;;  %v52_v16 = vld [vmem:[#allocation5 + $0x28] sm:$0xff]  ;;  %v69_v17 = vld [vmem:[#allocation5 + $0xb0] sm:$0xff]  ;;  %v70_v18 = vld [vmem:[#allocation5 + $0xb8] sm:$0xff] }
  0x2c   :  { %225 = vmatprep.subr.bf16.mxu0 %v224_v8  ;;  %253 = vmatprep.subr.bf16.mxu1 %v224_v8  ;;  %v230_v19 = vpack.c.bf16 %v52_v16, %v51_v15  ;;  %v232_v20 = vpack.c.bf16 %v70_v18, %v69_v17  ;;  %v53_v21 = vld [vmem:[#allocation5 + $0x30] sm:$0xff]  ;;  %v54_v22 = vld [vmem:[#allocation5 + $0x38] sm:$0xff]  ;;  %v71_v23 = vld [vmem:[#allocation5 + $0xc0] sm:$0xff]  ;;  %p326_p5 = por %p325_p4, %p324_p3 }
  0x2d   :  { %v72_v24 = vld [vmem:[#allocation5 + $0xc8] sm:$0xff]  ;;  %v46_v26 = vld [vmem:[#allocation2 + $0x18] sm:$0xff]  ;;  %v234_v27 = vpack.c.bf16 %v54_v22, %v53_v21  ;;  %v55_v29 = vld [vmem:[#allocation5 + $0x40] sm:$0xff] }
  0x2e   :  { %v44_v25 = vld [vmem:[#allocation2 + $0x8] sm:$0xff]  ;;  %v236_v28 = vpack.c.bf16 %v72_v24, %v71_v23  ;;  %v73_v31 = vld [vmem:[#allocation5 + $0xd0] sm:$0xff]  ;;  %v74_v32 = vld [vmem:[#allocation5 + $0xd8] sm:$0xff]  ;;  %155 = vmatprep.mubr.f32.mxu1 %v46_v26  ;;  %p327_p6 = pnand %p326_p5, %p320_p2 }
  0x2f   :  { %227 = vmatpush3.bf16.msra.mxu0 %v226_v13  ;;  %261 = vmatpush3.bf16.msra.mxu1 %v226_v13  ;;  %v56_v30 = vld [vmem:[#allocation5 + $0x48] sm:$0xff]  ;;  %v240_v34 = vpack.c.bf16 %v74_v32, %v73_v31  ;;  %v57_v35 = vld [vmem:[#allocation5 + $0x50] sm:$0xff]  ;;  %v58_v36 = vld [vmem:[#allocation5 + $0x58] sm:$0xff] }
  0x30   :  { %229 = vmatprep.subr.bf16.mxu0 %v228_v14  ;;  %254 = vmatprep.subr.bf16.mxu1 %v228_v14  ;;  %v238_v33 = vpack.c.bf16 %v56_v30, %v55_v29  ;;  %v75_v37 = vld [vmem:[#allocation5 + $0xe0] sm:$0xff]  ;;  %v76_v38 = vld [vmem:[#allocation5 + $0xe8] sm:$0xff]  ;;  %v242_v39 = vpack.c.bf16 %v58_v36, %v57_v35  ;;  %v77_v43 = vld [vmem:[#allocation5 + $0xf0] sm:$0xff] }
  0x31   :  { %150 = vmatprep.mubr.f32.mxu0 %v44_v25  ;;  %v244_v40 = vpack.c.bf16 %v76_v38, %v75_v37  ;;  %v59_v41 = vld [vmem:[#allocation5 + $0x60] sm:$0xff]  ;;  %v60_v42 = vld [vmem:[#allocation5 + $0x68] sm:$0xff]  ;;  %v78_v44 = vld [vmem:[#allocation5 + $0xf8] sm:$0xff] }
  0x32   :  { %v246_v45 = vpack.c.bf16 %v60_v42, %v59_v41  ;;  %v248_v46 = vpack.c.bf16 %v78_v44, %v77_v43  ;;  %v61_v47 = vld [vmem:[#allocation5 + $0x70] sm:$0xff]  ;;  %v62_v48 = vld [vmem:[#allocation5 + $0x78] sm:$0xff]  ;;  %v43_v50 = vld [vmem:[#allocation2] sm:$0xff] }
  0x33   :  { %231 = vmatpush3.bf16.msra.mxu0 %v230_v19  ;;  %262 = vmatpush3.bf16.msra.mxu1 %v230_v19  ;;  %v250_v49 = vpack.c.bf16 %v62_v48, %v61_v47  ;;  %v45_v51 = vld [vmem:[#allocation2 + $0x10] sm:$0xff]  ;;  %v181_v54 = vld [vmem:[%s421_s2] ss:$0 sm:$0xff] }
  0x34   :  { %233 = vmatprep.subr.bf16.mxu0 %v232_v20  ;;  %255 = vmatprep.subr.bf16.mxu1 %v232_v20 }
  0x37   :  { %235 = vmatpush3.bf16.msra.mxu0 %v234_v27  ;;  %263 = vmatpush3.bf16.msra.mxu1 %v234_v27 }
  0x38   :  { %237 = vmatprep.subr.bf16.mxu0 %v236_v28  ;;  %256 = vmatprep.subr.bf16.mxu1 %v236_v28 }
  0x3b   :  { %239 = vmatpush3.bf16.msra.mxu0 %v238_v33  ;;  %264 = vmatpush3.bf16.msra.mxu1 %v238_v33 }
  0x3c   :  { %241 = vmatprep.subr.bf16.mxu0 %v240_v34  ;;  %257 = vmatprep.subr.bf16.mxu1 %v240_v34 }
  0x3f   :  { %243 = vmatpush3.bf16.msra.mxu0 %v242_v39  ;;  %265 = vmatpush3.bf16.msra.mxu1 %v242_v39 }
  0x40   :  { %245 = vmatprep.subr.bf16.mxu0 %v244_v40  ;;  %258 = vmatprep.subr.bf16.mxu1 %v244_v40 }
  0x43   :  { %247 = vmatpush3.bf16.msra.mxu0 %v246_v45  ;;  %266 = vmatpush3.bf16.msra.mxu1 %v246_v45 }
  0x44   :  { %249 = vmatprep.subr.bf16.mxu0 %v248_v46  ;;  %259 = vmatprep.subr.bf16.mxu1 %v248_v46 }
  0x47   :  { %251 = vmatpush3.bf16.msra.mxu0 %v250_v49  ;;  %267 = vmatpush3.bf16.msra.mxu1 %v250_v49 }
  0x4a   :  { %151 = vmatmul.mubr.f32.vlgmr.msra.gmra.mrb[0].mxu0 %v43_v50  ;;  %156 = vmatmul.mubr.f32.vlgmr.msra.gmra.mrb[0].mxu1 %v45_v51 }
 0x11d   :  { %v214_v52 = vpop.f32.mrb[0].mxu0  ;;  %v217_v53 = vpop.f32.mrb[0].mxu1 }
 0x11e   :  { %v215_v55 = vpop.f32.mrb[1].mxu0  ;;  %v218_v56 = vpop.f32.mrb[1].mxu1 }
 0x11f   :  { %v216_v57 = vadd.f32 %v215_v55, %v214_v52  ;;  %v219_v58 = vadd.f32 %v218_v56, %v217_v53 }
 0x121   :  { %v153_v59 = vadd.f32 %v216_v57, %v181_v54  ;;  %v158_v60 = vadd.f32 %v219_v58, %v181_v54 }
 0x123   :  { %161 = vst [vmem:[#allocation7] sm:$0xff] %v153_v59  ;;  %162 = vst [vmem:[#allocation7 + $0x8] sm:$0xff] %v158_v60 }
 0x124   :  { %330 = shalt.err (!%p327_p6)
}
 0x125   :  { %s331_s17 = scalar_lea.hbm %s422_s3, 256 }
 0x126   :  { %p332_p7 = scmp.ne.s32.totalorder %s422_s3, %s331_s17  ;;  %p335_p8 = scmp.lt.u32.totalorder %s331_s17, %s422_s3 }
 0x128   :  { %p337_p9 = pnand %p335_p8, %p332_p7 }
 0x12a   :  { %340 = shalt.err (!%p337_p9)
}
 0x12b   :  { %174 = dma.vmem_to_hbm [thread:$0]  %s169_s14, 256, %s422_s3, [#allocation4], %s351_s0, %s351_s0, %s352_s9  }
 0x12c   :  { %345 = dma.done.wait [#allocation4], 256  }
 0x12d   :  { %346 = vsyncadd [#allocation4], 4294967040 }
 0x12e   :  { %178 = vsyncpa [#allocation3], 1 }
 0x12f   :  { %179 = vsyncpa [#allocation6], 1 }
 0x130   :  { %180 = vsyncpa [#allocation4], 1 }

</bundles_post_ra>
